<compile_context>
chip_gen: v7x
topology: tpu7x:2x2x1
jax: 0.10.0
libtpu: 0.0.40
codegen_flags: <defaults>
</compile_context>

<pallas_src>
import functools

import jax
import jax.numpy as jnp
from jax.experimental import pallas as pl
from jax.experimental.pallas import tpu as pltpu


_PAD_LANE = 512  # pad batch to a multiple of this -> waste bounded to <512 rows


def _round_up(x, m):
    return ((x + m - 1) // m) * m


def _choose_tile(bp, tb_max, lane=_PAD_LANE, min_tiles=2):
    """Largest lane-multiple divisor of bp that is <= tb_max.

    Prefers a tile that yields >= min_tiles grid steps (v7x megacore sharding).
    bp must be a multiple of `lane`.
    """
    tb_max = max(int(tb_max), lane)
    cands = [t for t in range(lane, min(bp, tb_max) + 1, lane) if bp % t == 0]
    if not cands:
        return int(bp)
    multi = [t for t in cands if bp // t >= min_tiles]
    return int(max(multi) if multi else max(cands))


# ----------------------------------------------------------------------------
# Pallas kernel: fused 3-layer MLP + (item_bias + user_bias + global_bias)
# ----------------------------------------------------------------------------
def _mlp_mf_kernel(feat_ref, bias_ref, w1_ref, b1_ref, w2_ref, b2_ref,
                   w3_ref, b3_ref, out_ref):
    cdt = w1_ref.dtype                  # stream/compute dtype (f32 or bf16)
    d = feat_ref.shape[0] - 1           # F + E (last row of the stream is item_bias)

    x = feat_ref[0:d, :]                # (F+E, TB) features, feature-major
    item_b = feat_ref[d:d + 1, :]       # (1, TB) item_bias (rode along in the gather)

    # Layer 1: single merged (64, F+E) x (F+E, TB) matmul, f32 accumulation.
    h1 = jnp.dot(w1_ref[...], x, preferred_element_type=jnp.float32)       # (64, TB)
    h1 = jnp.maximum(h1 + b1_ref[...], 0.0)                                 # Linear+ReLU

    # Layer 2.
    h2 = jnp.dot(w2_ref[...], h1.astype(cdt),
                 preferred_element_type=jnp.float32)                        # (32, TB)
    h2 = jnp.maximum(h2 + b2_ref[...], 0.0)                                 # Linear+ReLU

    # Layer 3 (32 -> 1): VPU multiply + sublane reduce, avoids an M=1 MXU pass.
    p = jnp.sum(h2 * w3_ref[...], axis=0, keepdims=True)                    # (1, TB)

    # Epilogue: + b3 + item_bias + (user_bias + global_bias); lane-dense store.
    out_ref[...] = p + b3_ref[...] + item_b.astype(jnp.float32) + bias_ref[...]


def mlp_mf_pallas(feat, bias_row, w1, b1, w2, b2, w3, b3, *, tb):
    dp1, bp = feat.shape                # dp1 = F + E + 1
    d = dp1 - 1
    assert bp % tb == 0 and tb % 128 == 0

    flops = 2 * bp * (64 * d + 32 * 64 + 32)
    bytes_accessed = sum(
        int(a.size) * jnp.dtype(a.dtype).itemsize
        for a in (feat, bias_row, w1, b1, w2, b2, w3, b3)
    ) + bp * 4  # output

    grid_spec = pltpu.PrefetchScalarGridSpec(
        num_scalar_prefetch=0,
        grid=(bp // tb,),
        in_specs=[
            # Per-example streams (feature-major: batch on the 128-lane axis).
            # TODO(synk): sweep pipeline_mode=pl.Buffered(3) here if a trace
            #             still shows exposed DMA after the larger tile.
            pl.BlockSpec((dp1, tb), lambda i: (0, i)),   # features + item_bias row
            pl.BlockSpec((1, tb), lambda i: (0, i)),     # user_bias + global_bias row
            # MLP weights: constant index_map -> VMEM-resident across the grid.
            pl.BlockSpec((64, d), lambda i: (0, 0)),     # w1 (merged)
            pl.BlockSpec((64, 1), lambda i: (0, 0)),     # b1
            pl.BlockSpec((32, 64), lambda i: (0, 0)),    # w2
            pl.BlockSpec((32, 1), lambda i: (0, 0)),     # b2
            pl.BlockSpec((32, 1), lambda i: (0, 0)),     # w3 column (VPU reduce)
            pl.BlockSpec((1, 1), lambda i: (0, 0)),      # b3
        ],
        out_specs=pl.BlockSpec((1, tb), lambda i: (0, i)),
    )

    return pl.pallas_call(
        _mlp_mf_kernel,
        out_shape=jax.ShapeDtypeStruct((1, bp), jnp.float32),
        grid_spec=grid_spec,
        compiler_params=pltpu.CompilerParams(
            dimension_semantics=("parallel",),
            vmem_limit_bytes=48 * 1024 * 1024),          # big tiles, all gens OK
        cost_estimate=pl.CostEstimate(
            flops=flops, transcendentals=0, bytes_accessed=bytes_accessed),
    )(feat, bias_row, w1, b1, w2, b2, w3, b3)


# ----------------------------------------------------------------------------
# Model wrapper (parameter setup + embedding gathers in plain JAX)
# ----------------------------------------------------------------------------
def init_params(key, n_users, n_items, n_factors, movie_embeddings, embedding_dim,
                table_dtype=jnp.float32):
    ks = jax.random.split(key, 10)
    d_in = n_factors + embedding_dim

    item_factors_t = jax.random.normal(ks[1], (n_factors, n_items), jnp.float32)
    item_bias = jax.random.normal(ks[2], (n_items,), jnp.float32) * 0.1
    movie_t = jnp.asarray(movie_embeddings, jnp.float32).T          # (E, n_items)

    # Single feature-major lookup table -> one gather per forward produces the
    # whole per-example stream; item_bias rides along as the last row.
    feat_table = jnp.concatenate(
        [item_factors_t, movie_t, item_bias[None, :]], axis=0).astype(table_dtype)

    w1 = jax.random.normal(ks[5], (d_in, 64), jnp.float32) / jnp.sqrt(d_in)
    return {
        # user_factors exists in the PyTorch module, but its forward result is
        # never used -> kept for parity, never gathered.
        "user_factors": jax.random.normal(ks[0], (n_users, n_factors), jnp.float32),
        "feat_table": feat_table,                                   # (F+E+1, n_items)
        "user_bias": jax.random.normal(ks[3], (n_users,), jnp.float32) * 0.1,
        "global_bias": jnp.zeros((1,), jnp.float32),
        # MLP: Linear(d_in,64) -> ReLU -> Linear(64,32) -> ReLU -> Linear(32,1)
        # Weights stored output-major (D_out, D_in).
        "w1_t": w1.T,                                               # (64, F+E)
        "b1": jax.random.normal(ks[4], (64, 1), jnp.float32) * 0.05,
        "w2_t": (jax.random.normal(ks[6], (64, 32), jnp.float32) / 8.0).T,  # (32, 64)
        "b2": jax.random.normal(ks[7], (32, 1), jnp.float32) * 0.05,
        "w3": jax.random.normal(ks[8], (32, 1), jnp.float32) / jnp.sqrt(32.0),
        "b3": jax.random.normal(ks[9], (1, 1), jnp.float32) * 0.05,
    }


@functools.partial(jax.jit, static_argnames=("tb_max", "compute_dtype"))
def mlp_mf_forward(params, user_idx, item_idx, *, tb_max=32768,
                   compute_dtype=jnp.float32):
    B = user_idx.shape[0]
    Bp = _round_up(B, _PAD_LANE)        # bounded padding (<= _PAD_LANE-1 rows wasted)
    tb = _choose_tile(Bp, tb_max)       # big lane-aligned tile; >= 2 tiles when possible
    pad = Bp - B

    user_p = jnp.pad(user_idx, (0, pad))   # pad with index 0: safe, output sliced to :B
    item_p = jnp.pad(item_idx, (0, pad))

    # NOTE: the PyTorch module also gathers user_factors(user_idx) but never
    # uses the result, so that dead gather is omitted.

    # Single feature-major gather -> one lane-dense (F+E+1, Bp) stream.
    feat = jnp.take(params["feat_table"], item_p, axis=1)
    if feat.dtype != compute_dtype:
        # Store the table in compute_dtype (table_dtype=...) to skip this cast pass.
        feat = feat.astype(compute_dtype)

    # user_bias + global_bias, lane-dense (1, Bp) f32 row (item_bias is in the table).
    bias_row = (params["user_bias"][user_p]
                + params["global_bias"][0])[None, :].astype(jnp.float32)

    out = mlp_mf_pallas(
        feat, bias_row,
        params["w1_t"].astype(compute_dtype), params["b1"],
        params["w2_t"].astype(compute_dtype), params["b2"],
        params["w3"], params["b3"], tb=tb)                          # (1, Bp) f32
    return out[0, :B]                                               # (B,)


def mlp_mf_reference(params, user_idx, item_idx):
    """Pure-JAX reference matching the PyTorch forward (f32, HIGHEST matmul precision)."""
    hp = jax.lax.Precision.HIGHEST
    table = params["feat_table"].astype(jnp.float32)
    feat = table[:-1].T[item_idx]                    # (B, F+E) = cat([item_h, movie_emb])
    item_bias = table[-1][item_idx]                  # (B,)
    h1 = jnp.maximum(jnp.dot(feat, params["w1_t"].T, precision=hp) + params["b1"][:, 0], 0.0)
    h2 = jnp.maximum(jnp.dot(h1, params["w2_t"].T, precision=hp) + params["b2"][:, 0], 0.0)
    pred = jnp.dot(h2, params["w3"], precision=hp)[:, 0] + params["b3"][0, 0]
    return pred + item_bias + params["user_bias"][user_idx] + params["global_bias"][0]


if __name__ == "__main__":
    key = jax.random.PRNGKey(0)
    n_users, n_items = 10, 12
    n_factors, embedding_dim = 16, 16
    batch = 8

    k_emb, k_params, k_u, k_i = jax.random.split(key, 4)
    movie_embeddings = jax.random.normal(k_emb, (n_items, embedding_dim), jnp.float32)
    params = init_params(k_params, n_users, n_items, n_factors,
                         movie_embeddings, embedding_dim)

    user_idx = jax.random.randint(k_u, (batch,), 0, n_users)
    item_idx = jax.random.randint(k_i, (batch,), 0, n_items)

    ref = mlp_mf_reference(params, user_idx, item_idx)

    # f32 streams: parity with the reference.
    out_f32 = jax.block_until_ready(
        mlp_mf_forward(params, user_idx, item_idx, compute_dtype=jnp.float32))
    assert out_f32.shape == (batch,)
    assert jnp.allclose(out_f32, ref, atol=1e-3, rtol=1e-3), (out_f32, ref)

    # bf16 streams (f32 accumulation): ~2x HBM-traffic win on v6e/v7x; the table
    # is stored in bf16 so the gather emits bf16 directly (no extra cast pass).
    params_bf16 = dict(params, feat_table=params["feat_table"].astype(jnp.bfloat16))
    out_bf16 = jax.block_until_ready(
        mlp_mf_forward(params_bf16, user_idx, item_idx, compute_dtype=jnp.bfloat16))
    assert out_bf16.shape == (batch,)
    assert jnp.allclose(out_bf16, ref, atol=1e-1, rtol=1e-1), (out_bf16, ref)

    print("KERNEL_OK")
</pallas_src>

<mosaic_0001>
module attributes {stable_mosaic.version = 11 : i64} {
  func.func @_mlp_mf_kernel(%arg0: i32, %arg1: memref<33x512xf32, #tpu.memory_space<vmem>>, %arg2: memref<1x512xf32, #tpu.memory_space<vmem>>, %arg3: memref<64x32xf32, #tpu.memory_space<vmem>>, %arg4: memref<64x1xf32, #tpu.memory_space<vmem>>, %arg5: memref<32x64xf32, #tpu.memory_space<vmem>>, %arg6: memref<32x1xf32, #tpu.memory_space<vmem>>, %arg7: memref<32x1xf32, #tpu.memory_space<vmem>>, %arg8: memref<1x1xf32, #tpu.memory_space<vmem>>, %arg9: memref<1x512xf32, #tpu.memory_space<vmem>>) attributes {dimension_semantics = [#tpu.dimension_semantics<parallel>], iteration_bounds = array<i64: 1>, scalar_prefetch = 0 : i64, scratch_operands = 0 : i64, tpu.core_type = #tpu.core_type<tc>, window_params = [{transform_indices = @transform_0, window_bounds = array<i64: 33, 512>}, {transform_indices = @transform_1, window_bounds = array<i64: 1, 512>}, {pipeline_mode = #tpu.pipeline_mode<synchronous>, transform_indices = @transform_2, window_bounds = array<i64: 64, 32>}, {pipeline_mode = #tpu.pipeline_mode<synchronous>, transform_indices = @transform_3, window_bounds = array<i64: 64, 1>}, {pipeline_mode = #tpu.pipeline_mode<synchronous>, transform_indices = @transform_4, window_bounds = array<i64: 32, 64>}, {pipeline_mode = #tpu.pipeline_mode<synchronous>, transform_indices = @transform_5, window_bounds = array<i64: 32, 1>}, {pipeline_mode = #tpu.pipeline_mode<synchronous>, transform_indices = @transform_6, window_bounds = array<i64: 32, 1>}, {pipeline_mode = #tpu.pipeline_mode<synchronous>, transform_indices = @transform_7, window_bounds = array<i64: 1, 1>}, {transform_indices = @transform_8, window_bounds = array<i64: 1, 512>}]} {
    %c0 = arith.constant 0 : index
    %c0_0 = arith.constant 0 : index
    %0 = vector.load %arg1[%c0, %c0_0] : memref<33x512xf32, #tpu.memory_space<vmem>>, vector<32x512xf32>
    %c32 = arith.constant 32 : index
    %c0_1 = arith.constant 0 : index
    %1 = vector.load %arg1[%c32, %c0_1] : memref<33x512xf32, #tpu.memory_space<vmem>>, vector<1x512xf32>
    %c0_2 = arith.constant 0 : index
    %c0_3 = arith.constant 0 : index
    %2 = vector.load %arg3[%c0_2, %c0_3] : memref<64x32xf32, #tpu.memory_space<vmem>>, vector<64x32xf32>
    %cst = arith.constant dense<0.000000e+00> : vector<64x512xf32>
    %3 = tpu.matmul %2, %0, %cst {dimension_numbers = #tpu.dot_dimension_numbers<[1], [0], [0], [1], [0, 0, 1, 1], [], []>} : vector<64x32xf32>, vector<32x512xf32>, vector<64x512xf32> -> vector<64x512xf32>
    %c0_4 = arith.constant 0 : index
    %c0_5 = arith.constant 0 : index
    %4 = vector.load %arg4[%c0_4, %c0_5] : memref<64x1xf32, #tpu.memory_space<vmem>>, vector<64x1xf32>
    %5 = vector.broadcast %4 : vector<64x1xf32> to vector<64x512xf32>
    %6 = arith.addf %3, %5 : vector<64x512xf32>
    %cst_6 = arith.constant 0.000000e+00 : f32
    %7 = vector.broadcast %cst_6 : f32 to vector<64x512xf32>
    %8 = arith.maximumf %6, %7 : vector<64x512xf32>
    %c0_7 = arith.constant 0 : index
    %c0_8 = arith.constant 0 : index
    %9 = vector.load %arg5[%c0_7, %c0_8] : memref<32x64xf32, #tpu.memory_space<vmem>>, vector<32x64xf32>
    %cst_9 = arith.constant dense<0.000000e+00> : vector<32x512xf32>
    %10 = tpu.matmul %9, %8, %cst_9 {dimension_numbers = #tpu.dot_dimension_numbers<[1], [0], [0], [1], [0, 0, 1, 1], [], []>} : vector<32x64xf32>, vector<64x512xf32>, vector<32x512xf32> -> vector<32x512xf32>
    %c0_10 = arith.constant 0 : index
    %c0_11 = arith.constant 0 : index
    %11 = vector.load %arg6[%c0_10, %c0_11] : memref<32x1xf32, #tpu.memory_space<vmem>>, vector<32x1xf32>
    %12 = vector.broadcast %11 : vector<32x1xf32> to vector<32x512xf32>
    %13 = arith.addf %10, %12 : vector<32x512xf32>
    %cst_12 = arith.constant 0.000000e+00 : f32
    %14 = vector.broadcast %cst_12 : f32 to vector<32x512xf32>
    %15 = arith.maximumf %13, %14 : vector<32x512xf32>
    %c0_13 = arith.constant 0 : index
    %c0_14 = arith.constant 0 : index
    %16 = vector.load %arg7[%c0_13, %c0_14] : memref<32x1xf32, #tpu.memory_space<vmem>>, vector<32x1xf32>
    %17 = vector.broadcast %16 : vector<32x1xf32> to vector<32x512xf32>
    %18 = arith.mulf %15, %17 : vector<32x512xf32>
    %cst_15 = arith.constant dense<0.000000e+00> : vector<512xf32>
    %19 = vector.multi_reduction <add>, %18, %cst_15 [0] : vector<32x512xf32> to vector<512xf32>
    %20 = vector.shape_cast %19 : vector<512xf32> to vector<1x512xf32>
    %c0_16 = arith.constant 0 : index
    %c0_17 = arith.constant 0 : index
    %21 = vector.load %arg8[%c0_16, %c0_17] : memref<1x1xf32, #tpu.memory_space<vmem>>, vector<1x1xf32>
    %22 = vector.broadcast %21 : vector<1x1xf32> to vector<1x512xf32>
    %23 = arith.addf %20, %22 : vector<1x512xf32>
    %24 = arith.addf %23, %1 : vector<1x512xf32>
    %c0_18 = arith.constant 0 : index
    %c0_19 = arith.constant 0 : index
    %25 = vector.load %arg2[%c0_18, %c0_19] : memref<1x512xf32, #tpu.memory_space<vmem>>, vector<1x512xf32>
    %26 = arith.addf %24, %25 : vector<1x512xf32>
    %c0_20 = arith.constant 0 : index
    %c0_21 = arith.constant 0 : index
    %27 = vector.load %arg9[%c0_20, %c0_21] : memref<1x512xf32, #tpu.memory_space<vmem>>, vector<1x512xf32>
    tpu.vector_store %arg9[%c0_20, %c0_21], %26 {strides = array<i32>} : memref<1x512xf32, #tpu.memory_space<vmem>>, vector<1x512xf32>,
    return
  }
  func.func @transform_0(%arg0: i32) -> (i32, i32) {
    %c0_i32 = arith.constant 0 : i32
    %c0_i32_0 = arith.constant 0 : i32
    return %c0_i32, %arg0 : i32, i32
  }
  func.func @transform_1(%arg0: i32) -> (i32, i32) {
    %c0_i32 = arith.constant 0 : i32
    %c0_i32_0 = arith.constant 0 : i32
    return %c0_i32, %arg0 : i32, i32
  }
  func.func @transform_2(%arg0: i32) -> (i32, i32) {
    %c0_i32 = arith.constant 0 : i32
    %c0_i32_0 = arith.constant 0 : i32
    %c0_i32_1 = arith.constant 0 : i32
    return %c0_i32, %c0_i32_0 : i32, i32
  }
  func.func @transform_3(%arg0: i32) -> (i32, i32) {
    %c0_i32 = arith.constant 0 : i32
    %c0_i32_0 = arith.constant 0 : i32
    %c0_i32_1 = arith.constant 0 : i32
    return %c0_i32, %c0_i32_0 : i32, i32
  }
  func.func @transform_4(%arg0: i32) -> (i32, i32) {
    %c0_i32 = arith.constant 0 : i32
    %c0_i32_0 = arith.constant 0 : i32
    %c0_i32_1 = arith.constant 0 : i32
    return %c0_i32, %c0_i32_0 : i32, i32
  }
  func.func @transform_5(%arg0: i32) -> (i32, i32) {
    %c0_i32 = arith.constant 0 : i32
    %c0_i32_0 = arith.constant 0 : i32
    %c0_i32_1 = arith.constant 0 : i32
    return %c0_i32, %c0_i32_0 : i32, i32
  }
  func.func @transform_6(%arg0: i32) -> (i32, i32) {
    %c0_i32 = arith.constant 0 : i32
    %c0_i32_0 = arith.constant 0 : i32
    %c0_i32_1 = arith.constant 0 : i32
    return %c0_i32, %c0_i32_0 : i32, i32
  }
  func.func @transform_7(%arg0: i32) -> (i32, i32) {
    %c0_i32 = arith.constant 0 : i32
    %c0_i32_0 = arith.constant 0 : i32
    %c0_i32_1 = arith.constant 0 : i32
    return %c0_i32, %c0_i32_0 : i32, i32
  }
  func.func @transform_8(%arg0: i32) -> (i32, i32) {
    %c0_i32 = arith.constant 0 : i32
    %c0_i32_0 = arith.constant 0 : i32
    return %c0_i32, %arg0 : i32, i32
  }
}

</mosaic_0001>

<bundles_post_ra>
// kernel: mlp_mf_forward.1
= control target key start
LH: loop header
LB: loop body
LE: loop exit
PB: predicated region body
PF: predicated region fallthrough
CT: control target
= control target key end

     0   :  { %v880_v3 = vmov 0.0   ;;  %v881_v9 = vmov 0   ;;  %vm105_vm0 = vcmask 261120   ;;  %vm416_vm1 = vcmask 523264   ;;  %s1122_s0 = inlined_call_operand.vmem [shape: f32[33,512], index: 0, kind: input, shape index: {}]   ;;  %s1123_s7 = inlined_call_operand.<no memory space> [shape: f32[1,1], index: 7, kind: input, shape index: {}]   ;;  %s1124_s2 = inlined_call_operand.vmem [shape: f32[64,32], index: 2, kind: input, shape index: {}]   ;;  %s1125_s3 = inlined_call_operand.vmem [shape: f32[64,1], index: 3, kind: input, shape index: {}]   ;;  %s1126_s5 = inlined_call_operand.vmem [shape: f32[32,1], index: 5, kind: input, shape index: {}]   ;;  %s1127_s6 = inlined_call_operand.vmem [shape: f32[32,1], index: 6, kind: input, shape index: {}]   ;;  %s1128_s4 = inlined_call_operand.vmem [shape: f32[32,64], index: 4, kind: input, shape index: {}]   ;;  %s1129_s1 = inlined_call_operand.vmem [shape: f32[1,512], index: 1, kind: input, shape index: {}]   ;;  %s1130_s8 = inlined_call_operand.vmem [shape: f32[1,512], index: 8, kind: output, shape index: {}]  }
   0x1   :  { %v32_v0 = vld [vmem:[%s1122_s0 + $0x8] sm:$0xff]  ;;  %v34_v2 = vld [vmem:[%s1122_s0 + $0x18] sm:$0xff]  ;;  %194 = vmatprep.mubr.f32.mxu0 %v880_v3  ;;  %307 = vmatprep.mubr.f32.mxu1 %v880_v3  ;;  %v13_v4 = vstv %s1123_s7  ;;  %v31_v7 = vld [vmem:[%s1122_s0] sm:$0xff] }
   0x2   :  { %v36_v1 = vld [vmem:[%s1122_s0 + $0x28] sm:$0xff]  ;;  %v38_v6 = vld [vmem:[%s1122_s0 + $0x38] sm:$0xff]  ;;  %v35_v8 = vld [vmem:[%s1122_s0 + $0x20] sm:$0xff]  ;;  %878 = vset.pattern.permute.xlu0 %v881_v9  ;;  %879 = vset.pattern.permute.xlu1 %v881_v9  ;;  %14 = vst [vmem:[#allocation2] sm:$0x1] %v13_v4 }
   0x3   :  { %v827_v5 = vpack.c.bf16 %v36_v1, %v32_v0  ;;  %v835_v10 = vpack.c.bf16 %v38_v6, %v34_v2  ;;  %v829_v11 = vpack.c.bf16 %v35_v8, %v31_v7  ;;  %v33_v12 = vld [vmem:[%s1122_s0 + $0x10] sm:$0xff]  ;;  %v40_v14 = vld [vmem:[%s1122_s0 + $0x48] sm:$0xff]  ;;  %v42_v17 = vld [vmem:[%s1122_s0 + $0x58] sm:$0xff] }
   0x4   :  { %v37_v13 = vld [vmem:[%s1122_s0 + $0x30] sm:$0xff]  ;;  %v44_v16 = vld [vmem:[%s1122_s0 + $0x68] sm:$0xff]  ;;  %v46_v18 = vld [vmem:[%s1122_s0 + $0x78] sm:$0xff] }
   0x5   :  { %828 = vmatprep.subr.bf16.mxu0 %v827_v5  ;;  %v837_v15 = vpack.c.bf16 %v37_v13, %v33_v12  ;;  %836 = vmatprep.subr.bf16.mxu1 %v835_v10  ;;  %v831_v19 = vpack.c.bf16 %v44_v16, %v40_v14  ;;  %v839_v20 = vpack.c.bf16 %v46_v18, %v42_v17  ;;  %v39_v21 = vld [vmem:[%s1122_s0 + $0x40] sm:$0xff]  ;;  %v41_v23 = vld [vmem:[%s1122_s0 + $0x50] sm:$0xff]  ;;  %v58_v30 = vld [vmem:[%s1125_s3 + $0x8] sm:$0xff] }
   0x6   :  { %830 = vmatpush1.bf16.msra.mxu0 %v829_v11  ;;  %v43_v22 = vld [vmem:[%s1122_s0 + $0x60] sm:$0xff]  ;;  %v45_v25 = vld [vmem:[%s1122_s0 + $0x70] sm:$0xff]  ;;  %v60_v31 = vld [vmem:[%s1125_s3 + $0x18] sm:$0xff] }
   0x7   :  { %838 = vmatpush1.bf16.msra.mxu1 %v837_v15  ;;  %v833_v24 = vpack.c.bf16 %v43_v22, %v39_v21  ;;  %832 = vmatprep.subr.bf16.mxu0 %v831_v19  ;;  %v841_v26 = vpack.c.bf16 %v45_v25, %v41_v23  ;;  %v49_v27 = vld [vmem:[%s1124_s2] sm:$0xff]  ;;  %v59_v29 = vld [vmem:[%s1125_s3 + $0x10] sm:$0xff]  ;;  %v50_v32 = vld [vmem:[%s1124_s2 + $0x8] sm:$0xff] }
   0x8   :  { %840 = vmatprep.subr.bf16.mxu1 %v839_v20  ;;  %v57_v28 = vld [vmem:[%s1125_s3] sm:$0xff]  ;;  %77 = vperm.xlu1 %879, %v59_v29   ;;  %v62_v34 = vld [vmem:[%s1125_s3 + $0x28] sm:$0xff]  ;;  %v51_v35 = vld [vmem:[%s1124_s2 + $0x10] sm:$0xff] }
   0x9   :  { %67 = vperm.xlu0 %878, %v57_v28   ;;  %v61_v33 = vld [vmem:[%s1125_s3 + $0x20] sm:$0xff]  ;;  %v63_v36 = vld [vmem:[%s1125_s3 + $0x30] sm:$0xff]  ;;  %v64_v37 = vld [vmem:[%s1125_s3 + $0x38] sm:$0xff] }
   0xa   :  { %834 = vmatpush1.bf16.msra.mxu0 %v833_v24  ;;  %v52_v38 = vld [vmem:[%s1124_s2 + $0x18] sm:$0xff]  ;;  %v392_v39 = vld [vmem:[%s1126_s5] sm:$0xff]  ;;  %v393_v40 = vld [vmem:[%s1126_s5 + $0x8] sm:$0xff] }
   0xb   :  { %842 = vmatpush1.bf16.msra.mxu1 %v841_v26  ;;  %v53_v41 = vld [vmem:[%s1124_s2 + $0x20] sm:$0xff]  ;;  %v394_v42 = vld [vmem:[%s1126_s5 + $0x10] sm:$0xff]  ;;  %v395_v43 = vld [vmem:[%s1126_s5 + $0x18] sm:$0xff] }
   0xc   :  { %82 = vperm.xlu1 %879, %v60_v31   ;;  %v54_v44 = vld [vmem:[%s1124_s2 + $0x28] sm:$0xff]  ;;  %v623_v45 = vld [vmem:[%s1127_s6] sm:$0xff]  ;;  %v55_v47 = vld [vmem:[%s1124_s2 + $0x30] sm:$0xff] }
   0xd   :  { %803 = vmatmul.mubr.msk.f32.vlgmr.msra.gmra.mrb[0].mxu0 %vm105_vm0, %v49_v27  ;;  %72 = vperm.xlu0 %878, %v58_v30   ;;  %v624_v46 = vld [vmem:[%s1127_s6 + $0x8] sm:$0xff]  ;;  %v625_v48 = vld [vmem:[%s1127_s6 + $0x10] sm:$0xff]  ;;  %v626_v49 = vld [vmem:[%s1127_s6 + $0x18] sm:$0xff] }
   0xe   :  { %811 = vmatmul.mubr.msk.f32.vlgmr.msra.gmra.mrb[0].mxu1 %vm105_vm0, %v49_v27  ;;  %200 = vmatprep.mubr.f32.mxu0 %v880_v3  ;;  %v56_v50 = vld [vmem:[%s1124_s2 + $0x38] sm:$0xff]  ;;  %v699_v51 = vld [vmem:[#allocation2] sm:$0x1] }
   0xf   :  { %313 = vmatprep.mubr.f32.mxu1 %v880_v3 }
  0x10   :  { %92 = vperm.xlu1 %879, %v62_v34  }
  0x11   :  { %804 = vmatmul.mubr.msk.f32.gmra.mrb[2].mxu0 %vm105_vm0, %v50_v32  ;;  %87 = vperm.xlu0 %878, %v61_v33  }
  0x12   :  { %812 = vmatmul.mubr.msk.f32.gmra.mrb[2].mxu1 %vm105_vm0, %v50_v32  ;;  %206 = vmatprep.mubr.f32.mxu0 %v880_v3 }
  0x13   :  { %319 = vmatprep.mubr.f32.mxu1 %v880_v3 }
  0x14   :  { %102 = vperm.xlu1 %879, %v64_v37  }
  0x15   :  { %805 = vmatmul.mubr.msk.f32.gmra.mrb[4].mxu0 %vm105_vm0, %v51_v35  ;;  %97 = vperm.xlu0 %878, %v63_v36  }
  0x16   :  { %813 = vmatmul.mubr.msk.f32.gmra.mrb[4].mxu1 %vm105_vm0, %v51_v35  ;;  %212 = vmatprep.mubr.f32.mxu0 %v880_v3 }
  0x17   :  { %325 = vmatprep.mubr.f32.mxu1 %v880_v3 }
  0x18   :  { %403 = vperm.xlu1 %879, %v393_v40  }
  0x19   :  { %806 = vmatmul.mubr.msk.f32.gmra.mrb[6].mxu0 %vm105_vm0, %v52_v38  ;;  %398 = vperm.xlu0 %878, %v392_v39  }
  0x1a   :  { %814 = vmatmul.mubr.msk.f32.gmra.mrb[6].mxu1 %vm105_vm0, %v52_v38  ;;  %218 = vmatprep.mubr.f32.mxu0 %v880_v3 }
  0x1b   :  { %331 = vmatprep.mubr.f32.mxu1 %v880_v3 }
  0x1c   :  { %413 = vperm.xlu1 %879, %v395_v43  }
  0x1d   :  { %807 = vmatmul.mubr.msk.f32.gmra.mrb[8].mxu0 %vm105_vm0, %v53_v41  ;;  %408 = vperm.xlu0 %878, %v394_v42  }
  0x1e   :  { %815 = vmatmul.mubr.msk.f32.gmra.mrb[8].mxu1 %vm105_vm0, %v53_v41  ;;  %224 = vmatprep.mubr.f32.mxu0 %v880_v3 }
  0x1f   :  { %337 = vmatprep.mubr.f32.mxu1 %v880_v3 }
  0x20   :  { %634 = vperm.xlu1 %879, %v624_v46  }
  0x21   :  { %808 = vmatmul.mubr.msk.f32.gmra.mrb[10].mxu0 %vm105_vm0, %v54_v44  ;;  %629 = vperm.xlu0 %878, %v623_v45  }
  0x22   :  { %816 = vmatmul.mubr.msk.f32.gmra.mrb[10].mxu1 %vm105_vm0, %v54_v44  ;;  %230 = vmatprep.mubr.f32.mxu0 %v880_v3 }
  0x23   :  { %343 = vmatprep.mubr.f32.mxu1 %v880_v3 }
  0x24   :  { %644 = vperm.xlu1 %879, %v626_v49  }
  0x25   :  { %809 = vmatmul.mubr.msk.f32.gmra.mrb[12].mxu0 %vm105_vm0, %v55_v47  ;;  %639 = vperm.xlu0 %878, %v625_v48  }
  0x26   :  { %817 = vmatmul.mubr.msk.f32.gmra.mrb[12].mxu1 %vm105_vm0, %v55_v47  ;;  %236 = vmatprep.mubr.f32.mxu0 %v880_v3 }
  0x27   :  { %349 = vmatprep.mubr.f32.mxu1 %v880_v3 }
  0x29   :  { %810 = vmatmul.mubr.msk.f32.gmra.mrb[14].mxu0 %vm105_vm0, %v56_v50  ;;  %702 = vperm.xlu0 %878, %v699_v51  }
  0x2a   :  { %818 = vmatmul.mubr.msk.f32.gmra.mrb[14].mxu1 %vm105_vm0, %v56_v50  ;;  %493 = vmatprep.mubr.f32.mxu0 %v880_v3 }
  0x2b   :  { %582 = vmatprep.mubr.f32.mxu1 %v880_v3 }
  0x87   :  { %v78_v2 = vpop.permute.xlu1 %77 }
  0x88   :  { %v68_v52 = vpop.permute.xlu0 %67 }
  0x8b   :  { %v83_v25 = vpop.permute.xlu1 %82 }
  0x8c   :  { %v73_v58 = vpop.permute.xlu0 %72 }
  0x90   :  { %v88_v49 = vpop.permute.xlu0 %87 }
  0xe0   :  { %v196_v53 = vpop.f32.mrb[0].mxu0 }
  0xe1   :  { %v309_v54 = vpop.f32.mrb[0].mxu1  ;;  %v198_v55 = vpop.f32.mrb[1].mxu0  ;;  %v197_v57 = vadd.f32 %v196_v53, %v68_v52 }
  0xe2   :  { %v311_v56 = vpop.f32.mrb[1].mxu1  ;;  %v310_v59 = vadd.f32 %v309_v54, %v68_v52  ;;  %v199_v60 = vadd.f32 %v198_v55, %v68_v52  ;;  %v93_v55 = vpop.permute.xlu1 %92 }
  0xe3   :  { %v312_v62 = vadd.f32 %v311_v56, %v68_v52  ;;  %v356_v7 = vmax.f32 %v197_v57, 0.0 }
  0xe4   :  { %v202_v61 = vpop.f32.mrb[2].mxu0  ;;  %v358_v10 = vmax.f32 %v310_v59, 0.0  ;;  %v357_v11 = vmax.f32 %v199_v60, 0.0 }
  0xe5   :  { %v203_v63 = vadd.f32 %v202_v61, %v73_v58  ;;  %v315_v0 = vpop.f32.mrb[2].mxu1  ;;  %v204_v1 = vpop.f32.mrb[3].mxu0  ;;  %v359_v15 = vmax.f32 %v312_v62, 0.0 }
  0xe6   :  { %v316_v4 = vadd.f32 %v315_v0, %v73_v58  ;;  %v205_v5 = vadd.f32 %v204_v1, %v73_v58  ;;  %v317_v6 = vpop.f32.mrb[3].mxu1 }
  0xe7   :  { %v360_v8 = vmax.f32 %v203_v63, 0.0  ;;  %v318_v9 = vadd.f32 %v317_v6, %v73_v58 }
  0xe8   :  { %v362_v12 = vmax.f32 %v316_v4, 0.0  ;;  %v361_v13 = vmax.f32 %v205_v5, 0.0  ;;  %v208_v14 = vpop.f32.mrb[4].mxu0 }
  0xe9   :  { %v845_v16 = vpack.c.bf16 %v360_v8, %v356_v7  ;;  %v363_v17 = vmax.f32 %v318_v9, 0.0  ;;  %v321_v18 = vpop.f32.mrb[4].mxu1  ;;  %v210_v19 = vpop.f32.mrb[5].mxu0  ;;  %v209_v24 = vadd.f32 %v208_v14, %v78_v2 }
  0xea   :  { %v861_v20 = vpack.c.bf16 %v362_v12, %v358_v10  ;;  %v843_v21 = vpack.c.bf16 %v361_v13, %v357_v11  ;;  %v323_v22 = vpop.f32.mrb[5].mxu1  ;;  %v322_v26 = vadd.f32 %v321_v18, %v78_v2  ;;  %v211_v27 = vadd.f32 %v210_v19, %v78_v2 }
  0xeb   :  { %v859_v23 = vpack.c.bf16 %v363_v17, %v359_v15  ;;  %v324_v29 = vadd.f32 %v323_v22, %v78_v2  ;;  %v364_v36 = vmax.f32 %v209_v24, 0.0  ;;  %v103_v22 = vpop.permute.xlu1 %102 }
  0xec   :  { %v214_v28 = vpop.f32.mrb[6].mxu0  ;;  %844 = vmatprep.subr.bf16.mxu0 %v843_v21  ;;  %v366_v39 = vmax.f32 %v322_v26, 0.0  ;;  %v365_v40 = vmax.f32 %v211_v27, 0.0 }
  0xed   :  { %v215_v30 = vadd.f32 %v214_v28, %v83_v25  ;;  %v327_v31 = vpop.f32.mrb[6].mxu1  ;;  %860 = vmatprep.subr.bf16.mxu1 %v859_v23  ;;  %v216_v32 = vpop.f32.mrb[7].mxu0  ;;  %846 = vmatpush1.bf16.msra.mxu0 %v845_v16  ;;  %v367_v44 = vmax.f32 %v324_v29, 0.0 }
  0xee   :  { %v328_v33 = vadd.f32 %v327_v31, %v83_v25  ;;  %v217_v34 = vadd.f32 %v216_v32, %v83_v25  ;;  %v329_v35 = vpop.f32.mrb[7].mxu1  ;;  %862 = vmatpush1.bf16.msra.mxu1 %v861_v20  ;;  %v98_v16 = vpop.permute.xlu0 %97 }
  0xef   :  { %v368_v37 = vmax.f32 %v215_v30, 0.0  ;;  %v330_v38 = vadd.f32 %v329_v35, %v83_v25 }
  0xf0   :  { %v370_v41 = vmax.f32 %v328_v33, 0.0  ;;  %v369_v42 = vmax.f32 %v217_v34, 0.0  ;;  %v220_v43 = vpop.f32.mrb[8].mxu0 }
  0xf1   :  { %v849_v45 = vpack.c.bf16 %v368_v37, %v364_v36  ;;  %v371_v46 = vmax.f32 %v330_v38, 0.0  ;;  %v333_v47 = vpop.f32.mrb[8].mxu1  ;;  %v222_v48 = vpop.f32.mrb[9].mxu0  ;;  %v221_v54 = vadd.f32 %v220_v43, %v88_v49 }
  0xf2   :  { %v865_v50 = vpack.c.bf16 %v370_v41, %v366_v39  ;;  %v847_v51 = vpack.c.bf16 %v369_v42, %v365_v40  ;;  %v335_v52 = vpop.f32.mrb[9].mxu1  ;;  %v334_v56 = vadd.f32 %v333_v47, %v88_v49  ;;  %v223_v57 = vadd.f32 %v222_v48, %v88_v49  ;;  %v389_v47 = vld [vmem:[%s1128_s4 + $0x8] sm:$0xff]  ;;  %v390_v48 = vld [vmem:[%s1128_s4 + $0x10] sm:$0xff] }
  0xf3   :  { %v863_v53 = vpack.c.bf16 %v371_v46, %v367_v44  ;;  %v336_v59 = vadd.f32 %v335_v52, %v88_v49  ;;  %v372_v2 = vmax.f32 %v221_v54, 0.0  ;;  %v388_v46 = vld [vmem:[%s1128_s4] sm:$0xff]  ;;  %v391_v49 = vld [vmem:[%s1128_s4 + $0x18] sm:$0xff] }
  0xf4   :  { %v226_v58 = vpop.f32.mrb[10].mxu0  ;;  %848 = vmatprep.subr.bf16.mxu0 %v847_v51  ;;  %v374_v6 = vmax.f32 %v334_v56, 0.0  ;;  %v373_v7 = vmax.f32 %v223_v57, 0.0  ;;  %v404_v51 = vpop.permute.xlu1 %403 }
  0xf5   :  { %v227_v60 = vadd.f32 %v226_v58, %v93_v55  ;;  %v339_v61 = vpop.f32.mrb[10].mxu1  ;;  %864 = vmatprep.subr.bf16.mxu1 %v863_v53  ;;  %v228_v62 = vpop.f32.mrb[11].mxu0  ;;  %850 = vmatpush1.bf16.msra.mxu0 %v849_v45  ;;  %v375_v11 = vmax.f32 %v336_v59, 0.0 }
  0xf6   :  { %v340_v63 = vadd.f32 %v339_v61, %v93_v55  ;;  %v229_v0 = vadd.f32 %v228_v62, %v93_v55  ;;  %v341_v1 = vpop.f32.mrb[11].mxu1  ;;  %866 = vmatpush1.bf16.msra.mxu1 %v865_v50  ;;  %v399_v50 = vpop.permute.xlu0 %398 }
  0xf7   :  { %v376_v4 = vmax.f32 %v227_v60, 0.0  ;;  %v342_v5 = vadd.f32 %v341_v1, %v93_v55 }
  0xf8   :  { %v378_v8 = vmax.f32 %v340_v63, 0.0  ;;  %v377_v9 = vmax.f32 %v229_v0, 0.0  ;;  %v232_v10 = vpop.f32.mrb[12].mxu0  ;;  %v414_v57 = vpop.permute.xlu1 %413 }
  0xf9   :  { %v853_v12 = vpack.c.bf16 %v376_v4, %v372_v2  ;;  %v379_v13 = vmax.f32 %v342_v5, 0.0  ;;  %v345_v14 = vpop.f32.mrb[12].mxu1  ;;  %v234_v15 = vpop.f32.mrb[13].mxu0  ;;  %v233_v21 = vadd.f32 %v232_v10, %v98_v16 }
  0xfa   :  { %v869_v17 = vpack.c.bf16 %v378_v8, %v374_v6  ;;  %v851_v18 = vpack.c.bf16 %v377_v9, %v373_v7  ;;  %v347_v19 = vpop.f32.mrb[13].mxu1  ;;  %v346_v23 = vadd.f32 %v345_v14, %v98_v16  ;;  %v235_v24 = vadd.f32 %v234_v15, %v98_v16  ;;  %v409_v52 = vpop.permute.xlu0 %408 }
  0xfb   :  { %v867_v20 = vpack.c.bf16 %v379_v13, %v375_v11  ;;  %v348_v26 = vadd.f32 %v347_v19, %v98_v16  ;;  %v380_v33 = vmax.f32 %v233_v21, 0.0 }
  0xfc   :  { %v238_v25 = vpop.f32.mrb[14].mxu0  ;;  %852 = vmatprep.subr.bf16.mxu0 %v851_v18  ;;  %v382_v36 = vmax.f32 %v346_v23, 0.0  ;;  %v381_v37 = vmax.f32 %v235_v24, 0.0  ;;  %v635_v13 = vpop.permute.xlu1 %634 }
  0xfd   :  { %v239_v27 = vadd.f32 %v238_v25, %v103_v22  ;;  %v351_v28 = vpop.f32.mrb[14].mxu1  ;;  %868 = vmatprep.subr.bf16.mxu1 %v867_v20  ;;  %v240_v29 = vpop.f32.mrb[15].mxu0  ;;  %854 = vmatpush1.bf16.msra.mxu0 %v853_v12  ;;  %v383_v40 = vmax.f32 %v348_v26, 0.0 }
  0xfe   :  { %v352_v30 = vadd.f32 %v351_v28, %v103_v22  ;;  %v241_v31 = vadd.f32 %v240_v29, %v103_v22  ;;  %v353_v32 = vpop.f32.mrb[15].mxu1  ;;  %870 = vmatpush1.bf16.msra.mxu1 %v869_v17  ;;  %v630_v6 = vpop.permute.xlu0 %629 }
  0xff   :  { %v384_v34 = vmax.f32 %v239_v27, 0.0  ;;  %v354_v35 = vadd.f32 %v353_v32, %v103_v22 }
 0x100   :  { %v386_v38 = vmax.f32 %v352_v30, 0.0  ;;  %v385_v39 = vmax.f32 %v241_v31, 0.0 }
 0x101   :  { %v857_v41 = vpack.c.bf16 %v384_v34, %v380_v33  ;;  %v387_v42 = vmax.f32 %v354_v35, 0.0 }
 0x102   :  { %v873_v43 = vpack.c.bf16 %v386_v38, %v382_v36  ;;  %v855_v44 = vpack.c.bf16 %v385_v39, %v381_v37  ;;  %v640_v34 = vpop.permute.xlu0 %639 }
 0x103   :  { %v871_v45 = vpack.c.bf16 %v387_v42, %v383_v40 }
 0x104   :  { %856 = vmatprep.subr.bf16.mxu0 %v855_v44 }
 0x105   :  { %872 = vmatprep.subr.bf16.mxu1 %v871_v45  ;;  %858 = vmatpush1.bf16.msra.mxu0 %v857_v41 }
 0x106   :  { %874 = vmatpush1.bf16.msra.mxu1 %v873_v43 }
 0x108   :  { %819 = vmatmul.mubr.msk.f32.vlgmr.msra.gmra.mrb[16].mxu0 %vm416_vm1, %v388_v46 }
 0x109   :  { %823 = vmatmul.mubr.msk.f32.vlgmr.msra.gmra.mrb[16].mxu1 %vm416_vm1, %v388_v46  ;;  %499 = vmatprep.mubr.f32.mxu0 %v880_v3 }
 0x10a   :  { %588 = vmatprep.mubr.f32.mxu1 %v880_v3 }
 0x10c   :  { %820 = vmatmul.mubr.msk.f32.gmra.mrb[18].mxu0 %vm416_vm1, %v389_v47 }
 0x10d   :  { %824 = vmatmul.mubr.msk.f32.gmra.mrb[18].mxu1 %vm416_vm1, %v389_v47  ;;  %505 = vmatprep.mubr.f32.mxu0 %v880_v3 }
 0x10e   :  { %594 = vmatprep.mubr.f32.mxu1 %v880_v3 }
 0x110   :  { %821 = vmatmul.mubr.msk.f32.gmra.mrb[20].mxu0 %vm416_vm1, %v390_v48 }
 0x111   :  { %825 = vmatmul.mubr.msk.f32.gmra.mrb[20].mxu1 %vm416_vm1, %v390_v48  ;;  %511 = vmatprep.mubr.f32.mxu0 %v880_v3 }
 0x112   :  { %600 = vmatprep.mubr.f32.mxu1 %v880_v3 }
 0x114   :  { %822 = vmatmul.mubr.msk.f32.gmra.mrb[22].mxu0 %vm416_vm1, %v391_v49 }
 0x115   :  { %826 = vmatmul.mubr.msk.f32.gmra.mrb[22].mxu1 %vm416_vm1, %v391_v49 }
 0x1db   :  { %v495_v53 = vpop.f32.mrb[16].mxu0 }
 0x1dc   :  { %v496_v54 = vadd.f32 %v495_v53, %v399_v50  ;;  %v584_v55 = vpop.f32.mrb[16].mxu1  ;;  %v497_v56 = vpop.f32.mrb[17].mxu0 }
 0x1dd   :  { %v585_v58 = vadd.f32 %v584_v55, %v399_v50  ;;  %v498_v59 = vadd.f32 %v497_v56, %v399_v50  ;;  %v586_v60 = vpop.f32.mrb[17].mxu1  ;;  %v645_v55 = vpop.permute.xlu1 %644 }
 0x1de   :  { %v607_v61 = vmax.f32 %v496_v54, 0.0  ;;  %v587_v62 = vadd.f32 %v586_v60, %v399_v50 }
 0x1df   :  { %v609_v63 = vmax.f32 %v585_v58, 0.0  ;;  %v608_v0 = vmax.f32 %v498_v59, 0.0  ;;  %v501_v3 = vpop.f32.mrb[18].mxu0 }
 0x1e0   :  { %v610_v1 = vmax.f32 %v587_v62, 0.0  ;;  %v502_v2 = vadd.f32 %v501_v3, %v404_v51  ;;  %v590_v4 = vpop.f32.mrb[18].mxu1  ;;  %v503_v5 = vpop.f32.mrb[19].mxu0  ;;  %v647_v10 = vmul.f32 %v630_v6, %v607_v61 }
 0x1e1   :  { %v591_v7 = vadd.f32 %v590_v4, %v404_v51  ;;  %v504_v8 = vadd.f32 %v503_v5, %v404_v51  ;;  %v592_v9 = vpop.f32.mrb[19].mxu1  ;;  %v649_v14 = vmul.f32 %v630_v6, %v609_v63  ;;  %v648_v15 = vmul.f32 %v630_v6, %v608_v0 }
 0x1e2   :  { %v611_v11 = vmax.f32 %v502_v2, 0.0  ;;  %v593_v12 = vadd.f32 %v592_v9, %v404_v51  ;;  %v650_v19 = vmul.f32 %v630_v6, %v610_v1  ;;  %v705_v1 = vlaneseq }
 0x1e3   :  { %v613_v16 = vmax.f32 %v591_v7, 0.0  ;;  %v612_v17 = vmax.f32 %v504_v8, 0.0  ;;  %v507_v18 = vpop.f32.mrb[20].mxu0 }
 0x1e4   :  { %v651_v20 = vmul.f32 %v635_v13, %v611_v11  ;;  %v614_v21 = vmax.f32 %v593_v12, 0.0  ;;  %v508_v22 = vadd.f32 %v507_v18, %v409_v52  ;;  %v596_v23 = vpop.f32.mrb[20].mxu1  ;;  %v509_v24 = vpop.f32.mrb[21].mxu0  ;;  %vm795_vm2 = vcmp.lt.s32.totalorder %v705_v1, 512 }
 0x1e5   :  { %v653_v25 = vmul.f32 %v635_v13, %v613_v16  ;;  %v652_v26 = vmul.f32 %v635_v13, %v612_v17  ;;  %v597_v27 = vadd.f32 %v596_v23, %v409_v52  ;;  %v510_v28 = vadd.f32 %v509_v24, %v409_v52  ;;  %v598_v29 = vpop.f32.mrb[21].mxu1  ;;  %v802_v17 = vld [vmem:[%s1122_s0 + $0x80] ss:$8 sm:$0xf] }
 0x1e6   :  { %v663_v30 = vadd.f32 %v651_v20, %v647_v10  ;;  %v654_v31 = vmul.f32 %v635_v13, %v614_v21  ;;  %v615_v32 = vmax.f32 %v508_v22, 0.0  ;;  %v599_v33 = vadd.f32 %v598_v29, %v409_v52 }
 0x1e7   :  { %v681_v35 = vadd.f32 %v653_v25, %v649_v14  ;;  %v672_v36 = vadd.f32 %v652_v26, %v648_v15  ;;  %v617_v37 = vmax.f32 %v597_v27, 0.0  ;;  %v616_v38 = vmax.f32 %v510_v28, 0.0  ;;  %v513_v39 = vpop.f32.mrb[22].mxu0  ;;  %v703_v25 = vpop.permute.xlu0 %702  ;;  %v738_v26 = vld [vmem:[%s1129_s1] sm:$0xf] }
 0x1e8   :  { %v690_v40 = vadd.f32 %v654_v31, %v650_v19  ;;  %v655_v41 = vmul.f32 %v640_v34, %v615_v32  ;;  %v618_v42 = vmax.f32 %v599_v33, 0.0  ;;  %v514_v43 = vadd.f32 %v513_v39, %v414_v57  ;;  %v602_v44 = vpop.f32.mrb[22].mxu1  ;;  %v515_v45 = vpop.f32.mrb[23].mxu0 }
 0x1e9   :  { %v657_v46 = vmul.f32 %v640_v34, %v617_v37  ;;  %v656_v47 = vmul.f32 %v640_v34, %v616_v38  ;;  %v603_v48 = vadd.f32 %v602_v44, %v414_v57  ;;  %v516_v49 = vadd.f32 %v515_v45, %v414_v57  ;;  %v604_v50 = vpop.f32.mrb[23].mxu1 }
 0x1ea   :  { %v664_v51 = vadd.f32 %v663_v30, %v655_v41  ;;  %v658_v53 = vmul.f32 %v640_v34, %v618_v42  ;;  %v619_v52 = vmax.f32 %v514_v43, 0.0  ;;  %v605_v54 = vadd.f32 %v604_v50, %v414_v57 }
 0x1eb   :  { %v682_v56 = vadd.f32 %v681_v35, %v657_v46  ;;  %v673_v58 = vadd.f32 %v672_v36, %v656_v47  ;;  %v621_v59 = vmax.f32 %v603_v48, 0.0  ;;  %v620_v60 = vmax.f32 %v516_v49, 0.0 }
 0x1ec   :  { %v691_v61 = vadd.f32 %v690_v40, %v658_v53  ;;  %v659_v62 = vmul.f32 %v645_v55, %v619_v52  ;;  %v622_v63 = vmax.f32 %v605_v54, 0.0  ;;  %v706_v57 = vshrl.u32 %v705_v1, 7 }
 0x1ed   :  { %v661_v0 = vmul.f32 %v645_v55, %v621_v59  ;;  %v660_v3 = vmul.f32 %v645_v55, %v620_v60  ;;  %v882_v35 = vmov 1966171168  }
 0x1ee   :  { %v665_v2 = vadd.f32 %v664_v51, %v659_v62  ;;  %v662_v4 = vmul.f32 %v645_v55, %v622_v63  ;;  %v707_v20 = vsub.s32 0, %v706_v57  ;;  %v720_v23 = vsub.s32 1, %v706_v57 }
 0x1ef   :  { %v683_v5 = vadd.f32 %v682_v56, %v661_v0  ;;  %v674_v6 = vadd.f32 %v673_v58, %v660_v3  ;;  %v724_v24 = vsub.s32 2, %v706_v57  ;;  %v728_v29 = vsub.s32 3, %v706_v57 }
 0x1f0   :  { %v666_v7 = vrot.slane %v665_v2, 4  ;;  %v692_v8 = vadd.f32 %v691_v61, %v662_v4  ;;  %v717_v32 = vrot.slane %v802_v17, %v707_v20  ;;  %v771_v36 = vunpack.c.l.s4 %v882_v35 }
 0x1f1   :  { %v684_v9 = vrot.slane %v683_v5, 4  ;;  %v675_v10 = vrot.slane %v674_v6, 4  ;;  %v708_v37 = vrot.slane %v703_v25, %v707_v20  ;;  %v743_v38 = vrot.slane %v738_v26, %v707_v20 }
 0x1f2   :  { %v667_v11 = vadd.f32 %v666_v7, %v665_v2  ;;  %v693_v12 = vrot.slane %v692_v8, 4  ;;  %v725_v42 = vrot.slane %v802_v17, %v724_v24  ;;  %v721_v44 = vrot.slane %v802_v17, %v720_v23 }
 0x1f3   :  { %v685_v13 = vadd.f32 %v684_v9, %v683_v5  ;;  %v676_v14 = vadd.f32 %v675_v10, %v674_v6  ;;  %v747_v45 = vrot.slane %v738_v26, %v720_v23  ;;  %v729_v48 = vrot.slane %v802_v17, %v728_v29 }
 0x1f4   :  { %v668_v15 = vrot.slane %v667_v11, 2  ;;  %v694_v16 = vadd.f32 %v693_v12, %v692_v8  ;;  %v751_v49 = vrot.slane %v738_v26, %v724_v24  ;;  %v772_v53 = vunpack.c.0.s8 %v771_v36 }
 0x1f5   :  { %v686_v18 = vrot.slane %v685_v13, 2  ;;  %v677_v19 = vrot.slane %v676_v14, 2  ;;  %v755_v52 = vrot.slane %v738_v26, %v728_v29 }
 0x1f6   :  { %v669_v21 = vadd.f32 %v668_v15, %v667_v11  ;;  %v695_v22 = vrot.slane %v694_v16, 2  ;;  %v775_v63 = vsub.s32 %v772_v53, %v706_v57 }
 0x1f7   :  { %v687_v27 = vadd.f32 %v686_v18, %v685_v13  ;;  %v678_v28 = vadd.f32 %v677_v19, %v676_v14 }
 0x1f8   :  { %v670_v30 = vrot.slane %v669_v21, 1  ;;  %v696_v31 = vadd.f32 %v695_v22, %v694_v16 }
 0x1f9   :  { %v688_v33 = vrot.slane %v687_v27, 1  ;;  %v679_v34 = vrot.slane %v678_v28, 1 }
 0x1fa   :  { %v671_v39 = vadd.f32 %v670_v30, %v669_v21  ;;  %v697_v40 = vrot.slane %v696_v31, 1 }
 0x1fb   :  { %v689_v41 = vadd.f32 %v688_v33, %v687_v27  ;;  %v680_v43 = vadd.f32 %v679_v34, %v678_v28 }
 0x1fc   :  { %v709_v46 = vadd.f32 %v708_v37, %v671_v39  ;;  %v698_v47 = vadd.f32 %v697_v40, %v696_v31 }
 0x1fd   :  { %v711_v50 = vadd.f32 %v708_v37, %v689_v41  ;;  %v710_v51 = vadd.f32 %v708_v37, %v680_v43 }
 0x1fe   :  { %v734_v54 = vadd.f32 %v717_v32, %v709_v46  ;;  %v712_v55 = vadd.f32 %v708_v37, %v698_v47 }
 0x1ff   :  { %v736_v56 = vadd.f32 %v725_v42, %v711_v50  ;;  %v735_v58 = vadd.f32 %v721_v44, %v710_v51 }
 0x200   :  { %v760_v59 = vadd.f32 %v743_v38, %v734_v54  ;;  %v737_v60 = vadd.f32 %v729_v48, %v712_v55 }
 0x201   :  { %v762_v61 = vadd.f32 %v751_v49, %v736_v56  ;;  %v761_v62 = vadd.f32 %v747_v45, %v735_v58 }
 0x202   :  { %v763_v0 = vadd.f32 %v755_v52, %v737_v60 }
 0x203   :  { %v768_v3 = vcombine.low %v760_v59, %v761_v62 }
 0x204   :  { %v769_v2 = vcombine.low %v762_v61, %v763_v0 }
 0x205   :  { %v776_v4 = vrot.slane %v768_v3, %v775_v63 }
 0x206   :  { %v783_v5 = vrot.slane %v769_v2, %v775_v63 }
 0x208   :  { %v784_v6 = vcombine.low %v776_v4, %v783_v5 }
 0x20a   :  { %v791_v7 = vrot.slane %v784_v6, %v775_v63 }
 0x20c   :  { %797 = vst.msk [vmem:[%s1130_s8] sm:$0xf] %vm795_vm2, %v791_v7 }

</bundles_post_ra>
